<compile_context>
chip_gen: v6e
topology: v6e:2x2x1
jax: 0.10.0
libtpu: 0.0.40
codegen_flags: <defaults>
</compile_context>

<pallas_src>
import functools
from typing import NamedTuple, Optional

import jax
import jax.numpy as jnp
from jax.experimental import pallas as pl
from jax.experimental.pallas import tpu as pltpu


def _round_up(x: int, m: int) -> int:
    return ((x + m - 1) // m) * m


def _cdiv(a: int, b: int) -> int:
    return (a + b - 1) // b


def _vmem_budget_bytes() -> int:
    """VMEM budget with headroom for compiler scratch / semaphores.

    v7x (64 MiB physical) -> 48 MiB; v5e/v6e (128 MiB) -> 96 MiB.
    """
    cap = 64 << 20
    try:
        info = pltpu.get_tpu_info()
        cap = int(getattr(info, "vmem_capacity_bytes", cap) or cap)
    except Exception:
        pass
    return min((cap * 3) // 4, 100 << 20)


def _divisor_tile(total: int, target: int, align: int) -> int:
    """Largest multiple of `align` that divides `total` and is <= target."""
    target = max(min(target, total), align)
    best = align
    d = align
    while d <= target:
        if total % d == 0:
            best = d
        d += align
    return best


# ------------------------------ activations ------------------------------- #
def _activate(y, tasktype: str, d_out_valid: int):
    if tasktype == "regression":
        return y                                              # Identity
    if tasktype in ("binary", "multilabel"):
        # sigmoid: exp + approx reciprocal both on the EUP slot.
        return pl.reciprocal(1.0 + jnp.exp(-y), approx=True)
    if tasktype == "classification":
        # Softmax over the full D_out row (single N tile, padded lanes masked).
        tm, tn = y.shape
        col = jax.lax.broadcasted_iota(jnp.int32, (tm, tn), 1)
        y = jnp.where(col < d_out_valid, y, -jnp.inf)
        m = jnp.max(y, axis=-1, keepdims=True)
        e = jnp.exp(y - m)
        return e / jnp.sum(e, axis=-1, keepdims=True)         # exact denom
    raise ValueError(f"unknown tasktype: {tasktype}")


# ----------------------------- Pallas kernels ------------------------------ #
def _glm_kernel_fused(x_ref, w_ref, b_ref, o_ref, *, tasktype: str,
                      d_out_valid: int):
    """num_k == 1: no accumulator round-trip, no K grid axis."""
    y = jnp.dot(x_ref[...], w_ref[...], preferred_element_type=jnp.float32)
    y = y + b_ref[...]                     # (TM, TN) + (1, TN) broadcast
    o_ref[...] = _activate(y, tasktype, d_out_valid).astype(o_ref.dtype)


def _glm_kernel_ktiled(x_ref, w_ref, b_ref, o_ref, acc_ref, *, tasktype: str,
                       d_out_valid: int):
    """K-tiled path: f32 VMEM accumulator, direct-write at k == 0."""
    k = pl.program_id(2)
    partial = jnp.dot(x_ref[...], w_ref[...],
                      preferred_element_type=jnp.float32)

    @pl.when(k == 0)
    def _():
        acc_ref[...] = partial             # no zero-init vst

    @pl.when(k != 0)
    def _():
        acc_ref[...] += partial

    @pl.when(k == pl.num_programs(2) - 1)
    def _():
        y = acc_ref[...] + b_ref[...]
        o_ref[...] = _activate(y, tasktype, d_out_valid).astype(o_ref.dtype)


# --------------------------- parameter preparation ------------------------- #
class GLMParams(NamedTuple):
    weight_padded: jax.Array   # (d_in_pad, d_out_pad), compute dtype
    bias_padded: jax.Array     # (1, d_out_pad), float32
    d_in: int
    d_out: int


def prepare_glm_params(weight_t, bias, *, compute_dtype=None) -> GLMParams:
    """One-time lane-dense pad (multiples of 128) + cast of the static params.

    Hoisted out of glm_forward so the weight is not re-padded / re-cast (an
    extra full HBM read+write) on every forward call.
    `compute_dtype=jnp.bfloat16` halves x/W HBM traffic (f32 accumulation).
    """
    d_in, d_out = weight_t.shape
    d_in_pad = _round_up(d_in, 128)
    d_out_pad = _round_up(d_out, 128)
    w_p = jnp.pad(weight_t, ((0, d_in_pad - d_in), (0, d_out_pad - d_out)))
    if compute_dtype is not None:
        w_p = w_p.astype(compute_dtype)
    b_p = jnp.pad(bias, (0, d_out_pad - d_out)).reshape(1, d_out_pad)
    return GLMParams(w_p, b_p.astype(jnp.float32), int(d_in), int(d_out))


# ------------------------------ JAX wrapper -------------------------------- #
def glm_forward(x, params: GLMParams, tasktype: str = "binary", *,
                tm: Optional[int] = None, tn: Optional[int] = None,
                max_tk: Optional[int] = None,
                vmem_budget: Optional[int] = None):
    """y = activation(x @ W + b) with W/b pre-padded by prepare_glm_params."""
    B, d_in = x.shape
    if d_in != params.d_in:
        raise ValueError(f"x has D_in={d_in}, params expect {params.d_in}")
    w_p, b_p = params.weight_padded, params.bias_padded
    d_in_pad, d_out_pad = w_p.shape
    d_out = params.d_out
    out_dtype = x.dtype

    budget = _vmem_budget_bytes() if vmem_budget is None else int(vmem_budget)
    big_vmem = budget >= (80 << 20)                 # v5e/v6e vs v7x
    tm_target = tm if tm is not None else (512 if big_vmem else 256)
    tn_target = tn if tn is not None else (512 if big_vmem else 256)

    in_bytes = jnp.dtype(w_p.dtype).itemsize        # x is cast to W's dtype
    out_bytes = jnp.dtype(out_dtype).itemsize
    sublane = 16 if in_bytes == 2 else 8            # bf16 sublane packing

    b_pad = _round_up(max(B, 1), sublane)

    # --- N tiles (classification keeps the whole row in one masked tile).
    if tasktype == "classification":
        tn_e, num_n = d_out_pad, 1
    else:
        tn_e = _divisor_tile(d_out_pad, tn_target, 128)
        num_n = d_out_pad // tn_e

    # --- M tiles: cover b_pad with minimal padding (no round-up to tm).
    num_m = max(1, _cdiv(b_pad, tm_target))
    tm_e = _round_up(_cdiv(b_pad, num_m), sublane)

    def working_set(tm_, tn_, tk_, nk_):
        s = 2 * tm_ * tk_ * in_bytes                # x tile, double-buffered
        s += 2 * tk_ * tn_ * in_bytes               # W tile, double-buffered
        s += 2 * tn_ * 4                            # bias tile
        s += 2 * tm_ * tn_ * out_bytes              # output tile
        if nk_ > 1:
            s += tm_ * tn_ * 4                      # f32 accumulator scratch
        return s

    # --- K tiles: prefer the full D_in (no K axis / no accumulator) when it
    # fits; shrink tm first (classification row tiles), then K-tile.
    tk_cap = d_in_pad if max_tk is None else min(_round_up(max_tk, 128),
                                                 d_in_pad)
    tk_e = _divisor_tile(d_in_pad, tk_cap, 128)
    num_k = d_in_pad // tk_e

    while working_set(tm_e, tn_e, tk_e, num_k) > budget and tm_e > sublane:
        tm_e = max(sublane, _round_up(tm_e // 2, sublane))
    if working_set(tm_e, tn_e, tk_e, num_k) > budget:
        # TODO(synk): online (two-pass) softmax across N tiles for extremely
        # large D_out; for now only the K axis is shrunk further.
        while tk_e > 128 and working_set(tm_e, tn_e, tk_e,
                                         d_in_pad // tk_e) > budget:
            tk_e = _divisor_tile(d_in_pad, tk_e - 128, 128)
        num_k = d_in_pad // tk_e

    num_m = max(1, _cdiv(b_pad, tm_e))
    tm_e = _round_up(_cdiv(b_pad, num_m), sublane)

    # Give v7x's second TensorCore work when the parallel grid would collapse.
    if num_m * num_n == 1 and b_pad > sublane:
        num_m = 2
        tm_e = _round_up(_cdiv(b_pad, num_m), sublane)

    b_grid = num_m * tm_e

    # Per-call padding/cast touches only the (small) activation.
    x_p = x.astype(w_p.dtype) if x.dtype != w_p.dtype else x
    x_p = jnp.pad(x_p, ((0, b_grid - B), (0, d_in_pad - d_in)))

    vmem_limit = int(min(budget,
                         max(32 << 20,
                             2 * working_set(tm_e, tn_e, tk_e, num_k))))

    if num_k == 1:
        kernel = functools.partial(_glm_kernel_fused, tasktype=tasktype,
                                   d_out_valid=d_out)
        grid_spec = pltpu.PrefetchScalarGridSpec(
            num_scalar_prefetch=0,
            grid=(num_n, num_m),                    # N outer, M inner
            in_specs=[
                pl.BlockSpec((tm_e, d_in_pad), lambda n, m: (m, 0)),   # x
                pl.BlockSpec((d_in_pad, tn_e), lambda n, m: (0, n)),   # W
                pl.BlockSpec((1, tn_e), lambda n, m: (0, n)),          # bias
            ],
            out_specs=pl.BlockSpec((tm_e, tn_e), lambda n, m: (m, n)),
        )
        dim_sem = ("parallel", "parallel")
    else:
        kernel = functools.partial(_glm_kernel_ktiled, tasktype=tasktype,
                                   d_out_valid=d_out)
        grid_spec = pltpu.PrefetchScalarGridSpec(
            num_scalar_prefetch=0,
            grid=(num_n, num_m, num_k),             # K last (reduction)
            in_specs=[
                pl.BlockSpec((tm_e, tk_e), lambda n, m, k: (m, k)),    # x
                pl.BlockSpec((tk_e, tn_e), lambda n, m, k: (k, n)),    # W
                pl.BlockSpec((1, tn_e), lambda n, m, k: (0, n)),       # bias
            ],
            out_specs=pl.BlockSpec((tm_e, tn_e), lambda n, m, k: (m, n)),
            scratch_shapes=[pltpu.VMEM((tm_e, tn_e), jnp.float32)],
        )
        dim_sem = ("parallel", "parallel", "arbitrary")

    out_p = pl.pallas_call(
        kernel,
        out_shape=jax.ShapeDtypeStruct((b_grid, d_out_pad), out_dtype),
        grid_spec=grid_spec,
        compiler_params=pltpu.CompilerParams(
            dimension_semantics=dim_sem,
            vmem_limit_bytes=vmem_limit,
        ),
    )(x_p, w_p, b_p)

    return out_p[:B, :d_out]


# ------------------------ deterministic param init ------------------------- #
def init_glm_params(key, input_dim: int, output_dim: int):
    # Mirrors nn.Linear default init: U(-1/sqrt(in), 1/sqrt(in)) for W and b.
    kw, kb = jax.random.split(key)
    bound = 1.0 / jnp.sqrt(jnp.float32(input_dim))
    # Stored pre-transposed as (D_in, D_out) for the kernel.
    weight_t = jax.random.uniform(
        kw, (input_dim, output_dim), jnp.float32, -bound, bound)
    bias = jax.random.uniform(kb, (output_dim,), jnp.float32, -bound, bound)
    return weight_t, bias


def _reference(x, weight_t, bias, tasktype):
    y = x @ weight_t + bias
    if tasktype == "regression":
        return y
    if tasktype in ("binary", "multilabel"):
        return jax.nn.sigmoid(y)
    if tasktype == "classification":
        return jax.nn.softmax(y, axis=-1)
    raise ValueError(tasktype)


if __name__ == "__main__":
    key = jax.random.PRNGKey(0)
    k_x, k_p = jax.random.split(key)

    batch, input_dim, output_dim = 24, 200, 24
    x = jax.random.normal(k_x, (batch, input_dim), jnp.float32)
    weight_t, bias = init_glm_params(k_p, input_dim, output_dim)

    # Static params padded / cast exactly once (hoisted out of the forward).
    params_f32 = prepare_glm_params(weight_t, bias)
    params_bf16 = prepare_glm_params(weight_t, bias,
                                     compute_dtype=jnp.bfloat16)

    ok = True
    # Tolerances cover MXU precision-pass / approx-reciprocal differences
    # while still catching structural/tiling bugs.
    checks = [
        ("regression", params_f32, {}, 1e-2),
        ("binary", params_f32, {}, 1e-2),
        ("multilabel", params_f32, {}, 1e-2),
        ("classification", params_f32, {}, 1e-2),
        # Multi-M-tile grid.
        ("binary", params_f32, dict(tm=8), 1e-2),
        # Force the K-tiled accumulator path explicitly.
        ("regression", params_f32, dict(max_tk=128), 1e-2),
        # bf16 MXU operands with f32 accumulation.
        ("regression", params_bf16, {}, 5e-2),
    ]
    for tasktype, params, kwargs, tol in checks:
        out = jax.block_until_ready(
            glm_forward(x, params, tasktype, **kwargs))
        ref = _reference(x, weight_t, bias, tasktype)
        if out.shape != ref.shape or not jnp.allclose(out, ref, atol=tol,
                                                      rtol=tol):
            ok = False

    if ok:
        print("KERNEL_OK")
</pallas_src>

<mosaic_0001>
module attributes {stable_mosaic.version = 11 : i64} {
  func.func @_glm_kernel_fused(%arg0: i32, %arg1: i32, %arg2: memref<16x256xf32, #tpu.memory_space<vmem>>, %arg3: memref<256x128xf32, #tpu.memory_space<vmem>>, %arg4: memref<1x128xf32, #tpu.memory_space<vmem>>, %arg5: memref<16x128xf32, #tpu.memory_space<vmem>>) attributes {dimension_semantics = [#tpu.dimension_semantics<parallel>, #tpu.dimension_semantics<parallel>], iteration_bounds = array<i64: 1, 2>, scalar_prefetch = 0 : i64, scratch_operands = 0 : i64, tpu.core_type = #tpu.core_type<tc>, window_params = [{transform_indices = @transform_0, window_bounds = array<i64: 16, 256>}, {transform_indices = @transform_1, window_bounds = array<i64: 256, 128>}, {transform_indices = @transform_2, window_bounds = array<i64: 1, 128>}, {transform_indices = @transform_3, window_bounds = array<i64: 16, 128>}]} {
    %c0 = arith.constant 0 : index
    %c0_0 = arith.constant 0 : index
    %0 = vector.load %arg2[%c0, %c0_0] : memref<16x256xf32, #tpu.memory_space<vmem>>, vector<16x256xf32>
    %c0_1 = arith.constant 0 : index
    %c0_2 = arith.constant 0 : index
    %1 = vector.load %arg3[%c0_1, %c0_2] : memref<256x128xf32, #tpu.memory_space<vmem>>, vector<256x128xf32>
    %cst = arith.constant dense<0.000000e+00> : vector<16x128xf32>
    %2 = tpu.matmul %0, %1, %cst {dimension_numbers = #tpu.dot_dimension_numbers<[1], [0], [0], [1], [0, 0, 1, 1], [], []>} : vector<16x256xf32>, vector<256x128xf32>, vector<16x128xf32> -> vector<16x128xf32>
    %c0_3 = arith.constant 0 : index
    %c0_4 = arith.constant 0 : index
    %3 = vector.load %arg4[%c0_3, %c0_4] : memref<1x128xf32, #tpu.memory_space<vmem>>, vector<1x128xf32>
    %4 = vector.broadcast %3 : vector<1x128xf32> to vector<16x128xf32>
    %5 = arith.addf %2, %4 : vector<16x128xf32>
    %c0_5 = arith.constant 0 : index
    %c0_6 = arith.constant 0 : index
    %6 = vector.load %arg5[%c0_5, %c0_6] : memref<16x128xf32, #tpu.memory_space<vmem>>, vector<16x128xf32>
    tpu.vector_store %arg5[%c0_5, %c0_6], %5 {strides = array<i32>} : memref<16x128xf32, #tpu.memory_space<vmem>>, vector<16x128xf32>,
    return
  }
  func.func @transform_0(%arg0: i32, %arg1: i32) -> (i32, i32) {
    %c0_i32 = arith.constant 0 : i32
    %c0_i32_0 = arith.constant 0 : i32
    return %arg1, %c0_i32 : i32, i32
  }
  func.func @transform_1(%arg0: i32, %arg1: i32) -> (i32, i32) {
    %c0_i32 = arith.constant 0 : i32
    %c0_i32_0 = arith.constant 0 : i32
    return %c0_i32, %arg0 : i32, i32
  }
  func.func @transform_2(%arg0: i32, %arg1: i32) -> (i32, i32) {
    %c0_i32 = arith.constant 0 : i32
    %c0_i32_0 = arith.constant 0 : i32
    return %c0_i32, %arg0 : i32, i32
  }
  func.func @transform_3(%arg0: i32, %arg1: i32) -> (i32, i32) {
    %c0_i32 = arith.constant 0 : i32
    return %arg1, %arg0 : i32, i32
  }
}

</mosaic_0001>

<bundles_post_ra>
// kernel: tpu_custom_call.1
= control target key start
LH: loop header
LB: loop body
LE: loop exit
PB: predicated region body
PF: predicated region fallthrough
CT: control target
= control target key end

     0   :  { %8 = vsyncpa [#allocation3], 0  ;;  %s1016_s0 = inlined_call_operand.hbm [shape: f32[32,256], index: 0, kind: input, shape index: {}]   ;;  %s1017_s1 = inlined_call_operand.hbm [shape: f32[256,128], index: 1, kind: input, shape index: {}]   ;;  %s1018_s2 = inlined_call_operand.vmem [shape: f32[1,128], index: 2, kind: input, shape index: {}]   ;;  %s1019_s3 = inlined_call_operand.hbm [shape: f32[32,128], index: 3, kind: output, shape index: {}]  }
   0x1   :  { %10 = vsyncpa [#allocation3 + $0x1], 0 }
   0x2   :  { %11 = vsyncpa [#allocation6], 0 }
   0x3   :  { %12 = vsyncpa [#allocation4], 0 }
   0x4   :  { %14 = vsyncpa [#allocation4 + $0x1], 0  ;;  %s825_s12 = smov 0   ;;  %s827_s13 = smov 0  }
   0x5   :  { %s829_s14 = smov 0   ;;  %s831_s15 = smov 0  }
   0x6   :  { %s833_s16 = smov 0   ;;  %s835_s17 = smov 0  }
   0x7 LB: > { %s484_s18 = sadd.s32 4294967295, %s794_s17   ;;  %s485_s19 = sadd.s32 4294967294, %s794_s17   ;;  %s794_s17 = sphi %s835_s17, %s20_s17   ;;  %s790_s16 = sphi %s833_s16, %s1037_s16   ;;  %s786_s15 = sphi %s831_s15, %s1036_s15   ;;  %s782_s14 = sphi %s829_s14, %s1035_s14   ;;  %s778_s13 = sphi %s827_s13, %s1034_s13   ;;  %s774_s12 = sphi %s825_s12, %s1033_s12  }
   0x8   : > { %p52_p0 = scmp.ne.s32.totalorder %s778_s13, %s774_s12  ;;  %p859_p1 = scmp.eq.s32.totalorder %s484_s18, 0 }
   0x9   : > { %p863_p2 = scmp.eq.s32.totalorder %s484_s18, 1  ;;  %p136_p3 = scmp.eq.s32.totalorder %s485_s19, 1 }
   0xa   : > { %p869_p4 = por %p859_p1, %p52_p0  ;;  %p486_p5 = scmp.ge.s32.totalorder %s794_s17, 1 }
   0xb   : > { %p874_p6 = por %p136_p3, %p52_p0  ;;  %p143_p7 = scmp.lt.s32.totalorder %s794_s17, 3 }
   0xc   : > { %s1023_s22 = scalar_select %p869_p4, 1, 0 }
   0xd   : > { %s1024_s23 = scalar_select %p874_p6, 1, 0 }
   0xe   : > { %p879_p8 = pnand %p486_p5, %p143_p7  ;;  %s796_s25 = smov [#allocation5]  }
   0xf   : > { %s157_s26 = sshll.u32 %s796_s25, 4  ;;  %s29_s28 = sadd.s32 1, %s790_s16  ;;  %s158_s26 = int_to_ptr.vmem [resolvable:$true] %s157_s26 }
  0x10   : > { %p585_p9 = pneg %p879_p8  ;;  %s667_s29 = scalar_lea.vmem %s158_s26, 4096 }
  0x11   : > { %p668_p13 = scmp.ne.s32.totalorder %s158_s26, %s667_s29  ;;  %p675_p5 = scmp.lt.s32.totalorder %s158_s26, %s158_s26 }
  0x12   : > { %p888_p11 = pnand %p585_p9, %p859_p1  ;;  %p676_p7 = scmp.lt.s32.totalorder %s667_s29, %s667_s29 }
  0x14   : > { %p658_p12 = pneg %p888_p11  ;;  %p677_p6 = por %p676_p7, %p675_p5 }
  0x16   : > { %p670_p0 = pnand %p668_p13, %p658_p12 }
  0x18   : > { %p671_p3 = pneg %p670_p0 }
  0x1a   : > { %p678_p4 = pnand %p677_p6, %p671_p3 }
  0x1c   : > { %681 = shalt.err (!%p678_p4)
}
  0x1d   : > { %s797_s30 = smov 128   ;;  %s798_s4 = smov 8  }
  0x1e   : > { %588 = dma.hbm_to_vmem [thread:$0]  (!%p888_p11), %s1017_s1, 4096, %s158_s26, [#allocation6], %s797_s30, %s797_s30, %s798_s4  }
  0x1f   : > { %p30_p6 = scmp.ge.s32.totalorder %s29_s28, 2  ;;  %s39_s7 = sadd.s32 1, %s782_s14 }
  0x20   : > { %p46_p4 = scmp.ne.s32.totalorder %s782_s14, %s778_s13  ;;  %p47_p9 = scmp.eq.s32.totalorder %s794_s17, 0 }
  0x21   : > { %s1039_s28 = smov (%p30_p6, %s29_s28), 0  ;;  %p598_p0 = scmp.lt.s32.totalorder %s794_s17, 2 }
  0x22   : > { %p906_p12 = por %p47_p9, %p46_p4  ;;  %p912_p13 = por %p863_p2, %p46_p4 }
  0x23   : > { %s36_s10 = ssub.s32 %s790_s16, %s1039_s28  ;;  %s177_s11 = sand.u32 1, %s782_s14  }
  0x24   : > { %p37_p11 = scmp.eq.s32.totalorder %s36_s10, 0  ;;  %s490_s18 = sshll.u32 %s177_s11, 5 }
  0x25   : > { %s505_s25 = sshll.u32 %s790_s16, 9  ;;  %s181_s30 = scalar_lea.vmem [#allocation2], %s490_s18 }
  0x26   : > { %s921_s19 = scalar_select %p37_p11, %s782_s14, %s39_s7  }
  0x27   : > { %s188_s29 = scalar_lea.hbm %s1016_s0, %s505_s25  ;;  %s189_s4 = sshll.u32 %s181_s30, 4  ;;  %s190_s4 = int_to_ptr.vmem [resolvable:$true] %s189_s4 }
  0x28   : > { %p929_p2 = pnand %p598_p0, %p906_p12  ;;  %s178_s5 = scalar_lea.sflag [#allocation3], %s177_s11 }
  0x29   : > { %s695_s6 = scalar_lea.vmem %s190_s4, 512  ;;  %s799_s7 = smov [#allocation2]  }
  0x2a   : > { %p684_p3 = pneg %p929_p2  ;;  %p696_p5 = scmp.ne.s32.totalorder %s190_s4, %s695_s6 }
  0x2b   : > { %s700_s10 = sshll.u32 %s799_s7, 4  ;;  %s701_s10 = int_to_ptr.vmem [resolvable:$false] %s700_s10 }
  0x2c   : > { %p698_p7 = pnand %p696_p5, %p684_p3  ;;  %s702_s25 = scalar_lea.vmem %s701_s10, 1024 }
  0x2d   : > { %p703_p4 = scmp.lt.s32.totalorder %s190_s4, %s701_s10  ;;  %p704_p9 = scmp.lt.s32.totalorder %s702_s25, %s695_s6 }
  0x2e   : > { %p699_p6 = pneg %p698_p7 }
  0x2f   : > { %p705_p11 = por %p704_p9, %p703_p4 }
  0x31   : > { %p706_p10 = pnand %p705_p11, %p699_p6 }
  0x33   : > { %709 = shalt.err (!%p706_p10)
}
  0x34   : > { %s800_s8 = smov 256   ;;  %s801_s18 = smov 16  }
  0x35   : > { %592 = dma.hbm_to_vmem [thread:$0]  (!%p929_p2), %s188_s29, 512, %s190_s4, %s178_s5, %s800_s8, %s800_s8, %s801_s18  }
  0x36   : > { %201 = sbr.rel (%p879_p8) target bundleno = 309 (0x135), region = 32  ;;  %s940_s11 = sand.u32 (!%p879_p8), 1, %s778_s13  }
  0x37   : > { %s495_s26 = sshll.u32 (!%p879_p8), %s940_s11, 5  ;;  %s204_s27 = scalar_lea.sflag (!%p879_p8), [#allocation3], %s940_s11 }
  0x38   : > { %s944_s30 = scalar_lea.vmem (!%p879_p8), [#allocation2], %s495_s26  ;;  %p1030_p12 = scmp.ne.s32.totalorder (!%p879_p8), %s1023_s22, 0 }
  0x3b   : > { %761 = dma.done.wait (%p1030_p12), %s204_s27, 512  }
  0x3c   : > { %763 = vsyncadd (%p1030_p12), %s204_s27, 4294966784 }
  0x3d   : > { %765 = dma.done.wait (%p859_p1), [#allocation6], 4096  }
  0x3e   : > { %767 = vsyncadd (%p859_p1), [#allocation6], 4294963200  ;;  %v277_v0 = vld [vmem:[#allocation5 + $0xf8] sm:$0xff]  ;;  %v276_v2 = vld [vmem:[#allocation5 + $0xf0] sm:$0xff]  ;;  %s497_s20 = sshll.u32 %s940_s11, 4  ;;  %s506_s29 = sshll.u32 %s786_s15, 8 }
  0x3f   : > { %v261_v1 = vld [vmem:[#allocation5 + $0x78] sm:$0xff]  ;;  %507 = vmatprep.subr.mxu0 %v277_v0  ;;  %545 = vmatprep.subr.mxu1 %v277_v0  ;;  %v260_v3 = vld [vmem:[#allocation5 + $0x70] sm:$0xff]  ;;  %v275_v4 = vld [vmem:[#allocation5 + $0xe8] sm:$0xff]  ;;  %s236_s22 = scalar_lea.vmem [#allocation7], %s497_s20  ;;  %s968_s7 = scalar_lea.hbm %s1019_s3, %s506_s29 }
  0x40   : > { %508 = vmatpush3.msra.mxu0 %v261_v1  ;;  %561 = vmatpush3.msra.mxu1 %v261_v1  ;;  %v259_v5 = vld [vmem:[#allocation5 + $0x68] sm:$0xff]  ;;  %v274_v6 = vld [vmem:[#allocation5 + $0xe0] sm:$0xff]  ;;  %v273_v8 = vld [vmem:[#allocation5 + $0xd8] sm:$0xff]  ;;  %s377_s24 = sshll.u32 %s236_s22, 4  ;;  %s363_s15 = scalar_lea.sflag [#allocation4], %s940_s11  ;;  %s963_s24 = int_to_ptr.vmem [resolvable:$true] %s377_s24 }
  0x41   : > { %509 = vmatprep.subr.mxu0 %v276_v2  ;;  %546 = vmatprep.subr.mxu1 %v276_v2  ;;  %v258_v7 = vld [vmem:[#allocation5 + $0x60] sm:$0xff]  ;;  %v257_v9 = vld [vmem:[#allocation5 + $0x58] sm:$0xff]  ;;  %v272_v10 = vld [vmem:[#allocation5 + $0xd0] sm:$0xff]  ;;  %s710_s10 = scalar_lea.vmem %s963_s24, 256  ;;  %s802_s25 = smov [#allocation7]  }
  0x42   : > { %510 = vmatpush3.msra.mxu0 %v260_v3  ;;  %562 = vmatpush3.msra.mxu1 %v260_v3  ;;  %v256_v11 = vld [vmem:[#allocation5 + $0x50] sm:$0xff]  ;;  %v271_v12 = vld [vmem:[#allocation5 + $0xc8] sm:$0xff]  ;;  %v270_v14 = vld [vmem:[#allocation5 + $0xc0] sm:$0xff]  ;;  %p711_p1 = scmp.ne.s32.totalorder %s963_s24, %s710_s10  ;;  %s714_s8 = sshll.u32 %s802_s25, 4  ;;  %s715_s8 = int_to_ptr.vmem [resolvable:$false] %s714_s8 }
  0x43   : > { %511 = vmatprep.subr.mxu0 %v275_v4  ;;  %547 = vmatprep.subr.mxu1 %v275_v4  ;;  %v255_v13 = vld [vmem:[#allocation5 + $0x48] sm:$0xff]  ;;  %v254_v15 = vld [vmem:[#allocation5 + $0x40] sm:$0xff]  ;;  %v269_v16 = vld [vmem:[#allocation5 + $0xb8] sm:$0xff]  ;;  %s716_s18 = scalar_lea.vmem %s715_s8, 512  ;;  %p717_p0 = scmp.lt.s32.totalorder %s963_s24, %s715_s8 }
  0x44   : > { %512 = vmatpush3.msra.mxu0 %v259_v5  ;;  %563 = vmatpush3.msra.mxu1 %v259_v5  ;;  %v253_v17 = vld [vmem:[#allocation5 + $0x38] sm:$0xff]  ;;  %v268_v18 = vld [vmem:[#allocation5 + $0xb0] sm:$0xff]  ;;  %v267_v20 = vld [vmem:[#allocation5 + $0xa8] sm:$0xff]  ;;  %p712_p8 = pnand %p711_p1, %p912_p13  ;;  %p718_p2 = scmp.lt.s32.totalorder %s716_s18, %s710_s10 }
  0x45   : > { %513 = vmatprep.subr.mxu0 %v274_v6  ;;  %548 = vmatprep.subr.mxu1 %v274_v6  ;;  %v252_v19 = vld [vmem:[#allocation5 + $0x30] sm:$0xff]  ;;  %v251_v21 = vld [vmem:[#allocation5 + $0x28] sm:$0xff]  ;;  %v266_v22 = vld [vmem:[#allocation5 + $0xa0] sm:$0xff] }
  0x46   : > { %514 = vmatpush3.msra.mxu0 %v258_v7  ;;  %564 = vmatpush3.msra.mxu1 %v258_v7  ;;  %v250_v23 = vld [vmem:[#allocation5 + $0x20] sm:$0xff]  ;;  %v265_v24 = vld [vmem:[#allocation5 + $0x98] sm:$0xff]  ;;  %v264_v26 = vld [vmem:[#allocation5 + $0x90] sm:$0xff]  ;;  %p713_p10 = pneg %p712_p8  ;;  %p719_p3 = por %p718_p2, %p717_p0 }
  0x47   : > { %515 = vmatprep.subr.mxu0 %v273_v8  ;;  %549 = vmatprep.subr.mxu1 %v273_v8  ;;  %v249_v25 = vld [vmem:[#allocation5 + $0x18] sm:$0xff]  ;;  %v248_v27 = vld [vmem:[#allocation5 + $0x10] sm:$0xff]  ;;  %v263_v28 = vld [vmem:[#allocation5 + $0x88] sm:$0xff] }
  0x48   : > { %516 = vmatpush3.msra.mxu0 %v257_v9  ;;  %565 = vmatpush3.msra.mxu1 %v257_v9  ;;  %v247_v29 = vld [vmem:[#allocation5 + $0x8] sm:$0xff]  ;;  %v262_v30 = vld [vmem:[#allocation5 + $0x80] sm:$0xff]  ;;  %v245_v33 = vld [vmem:[%s944_s30 + $0x18] sm:$0xff]  ;;  %p720_p5 = pnand %p719_p3, %p713_p10 }
  0x49   : > { %517 = vmatprep.subr.mxu0 %v272_v10  ;;  %550 = vmatprep.subr.mxu1 %v272_v10  ;;  %v246_v31 = vld [vmem:[#allocation5] sm:$0xff]  ;;  %v243_v32 = vld [vmem:[%s944_s30 + $0x8] sm:$0xff]  ;;  %v244_v35 = vld [vmem:[%s944_s30 + $0x10] sm:$0xff] }
  0x4a   : > { %518 = vmatpush3.msra.mxu0 %v256_v11  ;;  %566 = vmatpush3.msra.mxu1 %v256_v11  ;;  %v242_v34 = vld [vmem:[%s944_s30] sm:$0xff] }
  0x4b   : > { %519 = vmatprep.subr.mxu0 %v271_v12  ;;  %551 = vmatprep.subr.mxu1 %v271_v12  ;;  %v498_v38 = vld [vmem:[%s1018_s2] ss:$0 sm:$0xff] }
  0x4c   : > { %520 = vmatpush3.msra.mxu0 %v255_v13  ;;  %567 = vmatpush3.msra.mxu1 %v255_v13 }
  0x4d   : > { %521 = vmatprep.subr.mxu0 %v270_v14  ;;  %552 = vmatprep.subr.mxu1 %v270_v14 }
  0x4e   : > { %522 = vmatpush3.msra.mxu0 %v254_v15  ;;  %568 = vmatpush3.msra.mxu1 %v254_v15 }
  0x4f   : > { %523 = vmatprep.subr.mxu0 %v269_v16  ;;  %553 = vmatprep.subr.mxu1 %v269_v16 }
  0x50   : > { %524 = vmatpush3.msra.mxu0 %v253_v17  ;;  %569 = vmatpush3.msra.mxu1 %v253_v17 }
  0x51   : > { %525 = vmatprep.subr.mxu0 %v268_v18  ;;  %554 = vmatprep.subr.mxu1 %v268_v18 }
  0x52   : > { %526 = vmatpush3.msra.mxu0 %v252_v19  ;;  %570 = vmatpush3.msra.mxu1 %v252_v19 }
  0x53   : > { %527 = vmatprep.subr.mxu0 %v267_v20  ;;  %555 = vmatprep.subr.mxu1 %v267_v20 }
  0x54   : > { %528 = vmatpush3.msra.mxu0 %v251_v21  ;;  %571 = vmatpush3.msra.mxu1 %v251_v21 }
  0x55   : > { %529 = vmatprep.subr.mxu0 %v266_v22  ;;  %556 = vmatprep.subr.mxu1 %v266_v22 }
  0x56   : > { %530 = vmatpush3.msra.mxu0 %v250_v23  ;;  %572 = vmatpush3.msra.mxu1 %v250_v23 }
  0x57   : > { %531 = vmatprep.subr.mxu0 %v265_v24  ;;  %557 = vmatprep.subr.mxu1 %v265_v24 }
  0x58   : > { %532 = vmatpush3.msra.mxu0 %v249_v25  ;;  %573 = vmatpush3.msra.mxu1 %v249_v25 }
  0x59   : > { %533 = vmatprep.subr.mxu0 %v264_v26  ;;  %558 = vmatprep.subr.mxu1 %v264_v26 }
  0x5a   : > { %534 = vmatpush3.msra.mxu0 %v248_v27  ;;  %574 = vmatpush3.msra.mxu1 %v248_v27 }
  0x5b   : > { %535 = vmatprep.subr.mxu0 %v263_v28  ;;  %559 = vmatprep.subr.mxu1 %v263_v28 }
  0x5c   : > { %536 = vmatpush3.msra.mxu0 %v247_v29  ;;  %575 = vmatpush3.msra.mxu1 %v247_v29 }
  0x5d   : > { %537 = vmatprep.subr.mxu0 %v262_v30  ;;  %560 = vmatprep.subr.mxu1 %v262_v30 }
  0x5e   : > { %538 = vmatpush3.msra.mxu0 %v246_v31  ;;  %576 = vmatpush3.msra.mxu1 %v246_v31 }
  0x5f   : > { %349 = vmatprep.mubr.f32.mxu0 %v243_v32  ;;  %354 = vmatprep.mubr.f32.mxu1 %v245_v33 }
  0x60   : > { %350 = vmatmul.mubr.f32.vlgmr.msra.gmra.mxu0 %v242_v34  ;;  %355 = vmatmul.mubr.f32.vlgmr.msra.gmra.mxu1 %v244_v35 }
 0x120   : > { %v539_v36 = vpop.f32.mrf.mxu0  ;;  %v542_v37 = vpop.f32.mrf.mxu1 }
 0x122   : > { %v540_v39 = vpop.f32.mrf.mxu0  ;;  %v543_v40 = vpop.f32.mrf.mxu1 }
 0x123   : > { %v541_v41 = vadd.f32 %v540_v39, %v539_v36  ;;  %v544_v42 = vadd.f32 %v543_v40, %v542_v37 }
 0x125   : > { %v352_v43 = vadd.f32 %v541_v41, %v498_v38  ;;  %v357_v44 = vadd.f32 %v544_v42, %v498_v38 }
 0x127   : > { %360 = vst [vmem:[%s236_s22] sm:$0xff] %v352_v43  ;;  %361 = vst [vmem:[%s236_s22 + $0x8] sm:$0xff] %v357_v44 }
 0x128   : > { %723 = shalt.err (!%p720_p5)
}
 0x129   : > { %s724_s26 = scalar_lea.hbm %s968_s7, 256  ;;  %s728_s20 = scalar_lea.hbm %s1019_s3, 512 }
 0x12a   : > { %p725_p7 = scmp.ne.s32.totalorder %s968_s7, %s724_s26  ;;  %p729_p9 = scmp.lt.s32.totalorder %s968_s7, %s1019_s3 }
 0x12b   : > { %p730_p11 = scmp.lt.s32.totalorder %s728_s20, %s724_s26 }
 0x12c   : > { %p726_p6 = pnand %p725_p7, %p912_p13 }
 0x12d   : > { %p731_p12 = por %p730_p11, %p729_p9 }
 0x12e   : > { %p727_p4 = pneg %p726_p6 }
 0x130   : > { %p732_p1 = pnand %p731_p12, %p727_p4 }
 0x132   : > { %735 = shalt.err (!%p732_p1)
}
 0x133   : > { %s803_s4 = smov 128   ;;  %s804_s21 = smov 8  }
 0x134   : > { %583 = dma.vmem_to_hbm [thread:$0]  (%p912_p13), %s963_s24, 256, %s968_s7, %s363_s15, %s803_s4, %s803_s4, %s804_s21  }
 0x135 PF: > { %s392_s5 = sand.u32 1, %s774_s12   ;;  %p1031_p8 = scmp.ne.s32.totalorder %s1024_s23, 0 }
 0x136   : > { %p1032_p10 = scmp.ge.s32.totalorder %s794_s17, 2  ;;  %s393_s6 = scalar_lea.sflag [#allocation4], %s392_s5 }
 0x138   : > { %p594_p0 = pnand %p1032_p10, %p1031_p8 }
 0x13a   : > { %p595_p2 = pneg %p594_p0 }
 0x13c   : > { %769 = dma.done.wait (%p595_p2), %s393_s6, 256  }
 0x13d   : > { %771 = vsyncadd (%p595_p2), %s393_s6, 4294967040  ;;  %s20_s17 = sadd.s32 1, %s794_s17   ;;  %s1033_s12 = smov %s778_s13 }
 0x13e   : > { %p17_p3 = scmp.ge.s32.totalorder %s20_s17, 4   ;;  %s1034_s13 = smov %s782_s14 }
 0x13f   : > { %s1035_s14 = smov %s921_s19  ;;  %s1036_s15 = smov %s790_s16 }
 0x140   : > { %s1037_s16 = smov %s1039_s28  ;;  %19 = sbr.rel (!%p17_p3) target bundleno = 7 (0x7), region = 85 }
 0x145   :  { %398 = vsyncpa [#allocation3], 1 }
 0x146   :  { %400 = vsyncpa [#allocation3 + $0x1], 1 }
 0x147   :  { %401 = vsyncpa [#allocation6], 1 }
 0x148   :  { %402 = vsyncpa [#allocation4], 1 }
 0x149   :  { %404 = vsyncpa [#allocation4 + $0x1], 1 }

</bundles_post_ra>
